<compile_context>
chip_gen: v7x
topology: tpu7x:2x2x1
jax: 0.10.0
libtpu: 0.0.40
codegen_flags: <defaults>
</compile_context>

<pallas_src>
import functools

import jax
import jax.numpy as jnp
from jax.experimental import pallas as pl
from jax.experimental.pallas import tpu as pltpu

LN_EPS = 1e-5

# Row indices in the packed (6, D) small-parameter slab.
_BVO, _LN1G, _LN1B, _B2, _LN2G, _LN2B = range(6)


def _round_up(x, m):
    return (x + m - 1) // m * m


def trans_kernel(x_ref, wvo_ref, w1_ref, w2_ref, wout_ref,
                 vecs_ref, b1_ref, bout_ref, out_ref):
    x_bf = x_ref[...]                        # (TB, D) bf16 — MXU operand
    x = x_bf.astype(jnp.float32)             # f32 copy for residual / LayerNorm path

    vecs = vecs_ref[...]                     # (6, D) f32 packed small params
    b_vo  = vecs[_BVO:_BVO + 1, :]
    ln1_g = vecs[_LN1G:_LN1G + 1, :]
    ln1_b = vecs[_LN1B:_LN1B + 1, :]
    b2    = vecs[_B2:_B2 + 1, :]
    ln2_g = vecs[_LN2G:_LN2G + 1, :]
    ln2_b = vecs[_LN2B:_LN2B + 1, :]

    # --- self-attention over a length-1 sequence: softmax weight == 1 exactly,
    #     so attention output == V; V/O projections pre-folded into Wvo / bvo.
    attn_out = jnp.dot(x_bf, wvo_ref[...],
                       preferred_element_type=jnp.float32) + b_vo

    # --- residual + LayerNorm 1 (f32 elementwise; biased var, eps=1e-5) ----------
    h1 = x + attn_out
    mu1 = jnp.mean(h1, axis=-1, keepdims=True)
    d1 = h1 - mu1
    var1 = jnp.mean(d1 * d1, axis=-1, keepdims=True)
    h1n = d1 * jax.lax.rsqrt(var1 + LN_EPS) * ln1_g + ln1_b

    # --- feed-forward D -> 4D -> D with ReLU (bf16 operands, f32 accumulate) -----
    ff = jnp.dot(h1n.astype(jnp.bfloat16), w1_ref[...],
                 preferred_element_type=jnp.float32) + b1_ref[...]
    ff = jnp.maximum(ff, 0.0)
    ff = jnp.dot(ff.astype(jnp.bfloat16), w2_ref[...],
                 preferred_element_type=jnp.float32) + b2

    # --- residual + LayerNorm 2 ---------------------------------------------------
    h2 = h1n + ff
    mu2 = jnp.mean(h2, axis=-1, keepdims=True)
    d2 = h2 - mu2
    var2 = jnp.mean(d2 * d2, axis=-1, keepdims=True)
    h2n = d2 * jax.lax.rsqrt(var2 + LN_EPS) * ln2_g + ln2_b

    # --- final projection (N padded to a lane-dense multiple of 128) + sigmoid ---
    logits = jnp.dot(h2n.astype(jnp.bfloat16), wout_ref[...],
                     preferred_element_type=jnp.float32) + bout_ref[...]
    out_ref[...] = jax.nn.sigmoid(logits).astype(out_ref.dtype)


def trans_model_forward(item_indices, params, *, tb=256):
    """item_indices: (B,) int32.  Returns rating: (B, D) float32."""
    emb = params["embedding"]                                  # (num_items, D) f32
    D = emb.shape[1]
    Dff = params["w1"].shape[1]

    # ---- parameter folding / packing (exact transforms, done once per call) -----
    # seq_len == 1  =>  attention(x) == x @ (Wv @ Wo) + (bv @ Wo + bo).
    wvo = jnp.dot(params["wv"], params["wo"])                  # (D, D)
    bvo = jnp.dot(params["bv"], params["wo"]) + params["bo"]   # (1, D)
    # NOTE: wq/bq/wk/bk are mathematically dead for seq_len == 1 and never touched.

    # Pad the final projection's output dim to a multiple of 128 so the kernel's
    # output stores are lane-dense (unmasked vst); pad columns sliced off after.
    Npad = _round_up(D, 128)
    wout_p = jnp.pad(params["wout"], ((0, 0), (0, Npad - D)))
    bout_p = jnp.pad(params["bout"], ((0, 0), (0, Npad - D))).astype(jnp.float32)

    # Pack the six small (1, D) bias / LayerNorm vectors into one kernel input.
    vecs = jnp.concatenate(
        [bvo, params["ln1_g"], params["ln1_b"], params["b2"],
         params["ln2_g"], params["ln2_b"]], axis=0).astype(jnp.float32)   # (6, D)

    # bf16 MXU operands (f32 accumulation inside the kernel); biases/LN stay f32.
    wvo_bf = wvo.astype(jnp.bfloat16)
    w1_bf = params["w1"].astype(jnp.bfloat16)
    w2_bf = params["w2"].astype(jnp.bfloat16)
    wout_bf = wout_p.astype(jnp.bfloat16)
    b1 = params["b1"].astype(jnp.float32)

    # ---- activations: embedding gather stays as XLA glue ------------------------
    # TODO(synk): at very large B the gather could move in-kernel via manual DMA.
    x = jnp.take(emb, item_indices, axis=0).astype(jnp.bfloat16)          # (B, D)
    B = x.shape[0]

    # ---- batch tiling: few large tiles; pad B to a tile multiple ----------------
    tb = max(16, min(_round_up(tb, 16), _round_up(B, 16)))
    Bp = _round_up(B, tb)
    if Bp != B:
        x = jnp.pad(x, ((0, Bp - B), (0, 0)))
    grid = (Bp // tb,)

    def resident(shape):
        # Whole-array block, same block every grid step (stays VMEM-resident).
        return pl.BlockSpec(shape, lambda i, _s=len(shape): (0,) * _s)

    weight_bytes = (D * D + 2 * D * Dff + D * Npad) * 2 + (6 * D + Dff + Npad) * 4
    cost = pl.CostEstimate(
        flops=2 * Bp * (D * D + 2 * D * Dff + D * Npad),
        transcendentals=Bp * (Npad + 2),
        bytes_accessed=Bp * D * 2 + Bp * Npad * 4 + weight_bytes,
    )

    out = pl.pallas_call(
        trans_kernel,
        out_shape=jax.ShapeDtypeStruct((Bp, Npad), jnp.float32),
        grid_spec=pltpu.PrefetchScalarGridSpec(
            num_scalar_prefetch=0,
            grid=grid,
            in_specs=[
                pl.BlockSpec((tb, D), lambda i: (i, 0)),   # x (batch-tiled)
                resident((D, D)),                          # Wvo  (folded Wv @ Wo)
                resident((D, Dff)),                        # W1
                resident((Dff, D)),                        # W2
                resident((D, Npad)),                       # Wout (lane-padded)
                resident((6, D)),                          # packed biases / LN params
                resident((1, Dff)),                        # b1
                resident((1, Npad)),                       # bout (lane-padded)
            ],
            out_specs=pl.BlockSpec((tb, Npad), lambda i: (i, 0)),
        ),
        compiler_params=pltpu.CompilerParams(
            dimension_semantics=("parallel",)),
        cost_estimate=cost,
    )(x, wvo_bf, w1_bf, w2_bf, wout_bf, vecs, b1, bout_p)

    return out[:B, :D]


def init_params(key, num_items, latent_dim):
    D = latent_dim
    Dff = 4 * D
    keys = jax.random.split(key, 12)
    scale = 0.02

    def nrm(k, shape):
        return (scale * jax.random.normal(k, shape)).astype(jnp.float32)

    params = {
        "embedding": nrm(keys[0], (num_items, D)),
        "wq": nrm(keys[1], (D, D)),   "bq": jnp.zeros((1, D), jnp.float32),
        "wk": nrm(keys[2], (D, D)),   "bk": jnp.zeros((1, D), jnp.float32),
        "wv": nrm(keys[3], (D, D)),   "bv": jnp.zeros((1, D), jnp.float32),
        "wo": nrm(keys[4], (D, D)),   "bo": jnp.zeros((1, D), jnp.float32),
        "ln1_g": jnp.ones((1, D), jnp.float32),
        "ln1_b": jnp.zeros((1, D), jnp.float32),
        "w1": nrm(keys[5], (D, Dff)), "b1": jnp.zeros((1, Dff), jnp.float32),
        "w2": nrm(keys[6], (Dff, D)), "b2": jnp.zeros((1, D), jnp.float32),
        "ln2_g": jnp.ones((1, D), jnp.float32),
        "ln2_b": jnp.zeros((1, D), jnp.float32),
        "wout": nrm(keys[7], (D, D)), "bout": jnp.zeros((1, D), jnp.float32),
    }
    return params


if __name__ == "__main__":
    num_items = 100
    latent_dim = 32
    batch = 16

    key = jax.random.PRNGKey(0)
    pkey, ikey = jax.random.split(key)
    params = init_params(pkey, num_items, latent_dim)
    item_indices = jax.random.randint(ikey, (batch,), 0, num_items, dtype=jnp.int32)

    fwd = jax.jit(functools.partial(trans_model_forward, tb=256))
    rating = fwd(item_indices, params)
    jax.block_until_ready(rating)

    assert rating.shape == (batch, latent_dim)
    assert bool(jnp.all(jnp.isfinite(rating)))
    assert bool(jnp.all((rating > 0.0) & (rating < 1.0)))
    print("KERNEL_OK")
</pallas_src>

<mosaic_0001>
module attributes {stable_mosaic.version = 11 : i64} {
  func.func @trans_kernel(%arg0: i32, %arg1: memref<16x32xbf16, #tpu.memory_space<vmem>>, %arg2: memref<32x32xbf16, #tpu.memory_space<vmem>>, %arg3: memref<32x128xbf16, #tpu.memory_space<vmem>>, %arg4: memref<128x32xbf16, #tpu.memory_space<vmem>>, %arg5: memref<32x128xbf16, #tpu.memory_space<vmem>>, %arg6: memref<6x32xf32, #tpu.memory_space<vmem>>, %arg7: memref<1x128xf32, #tpu.memory_space<vmem>>, %arg8: memref<1x128xf32, #tpu.memory_space<vmem>>, %arg9: memref<16x128xf32, #tpu.memory_space<vmem>>) attributes {dimension_semantics = [#tpu.dimension_semantics<parallel>], iteration_bounds = array<i64: 1>, scalar_prefetch = 0 : i64, scratch_operands = 0 : i64, tpu.core_type = #tpu.core_type<tc>, window_params = [{transform_indices = @transform_0, window_bounds = array<i64: 16, 32>}, {pipeline_mode = #tpu.pipeline_mode<synchronous>, transform_indices = @transform_1, window_bounds = array<i64: 32, 32>}, {pipeline_mode = #tpu.pipeline_mode<synchronous>, transform_indices = @transform_2, window_bounds = array<i64: 32, 128>}, {pipeline_mode = #tpu.pipeline_mode<synchronous>, transform_indices = @transform_3, window_bounds = array<i64: 128, 32>}, {pipeline_mode = #tpu.pipeline_mode<synchronous>, transform_indices = @transform_4, window_bounds = array<i64: 32, 128>}, {pipeline_mode = #tpu.pipeline_mode<synchronous>, transform_indices = @transform_5, window_bounds = array<i64: 6, 32>}, {pipeline_mode = #tpu.pipeline_mode<synchronous>, transform_indices = @transform_6, window_bounds = array<i64: 1, 128>}, {pipeline_mode = #tpu.pipeline_mode<synchronous>, transform_indices = @transform_7, window_bounds = array<i64: 1, 128>}, {transform_indices = @transform_8, window_bounds = array<i64: 16, 128>}]} {
    %c0 = arith.constant 0 : index
    %c0_0 = arith.constant 0 : index
    %0 = vector.load %arg1[%c0, %c0_0] : memref<16x32xbf16, #tpu.memory_space<vmem>>, vector<16x32xbf16>
    %1 = arith.extf %0 : vector<16x32xbf16> to vector<16x32xf32>
    %c0_1 = arith.constant 0 : index
    %c0_2 = arith.constant 0 : index
    %2 = vector.load %arg6[%c0_1, %c0_2] : memref<6x32xf32, #tpu.memory_space<vmem>>, vector<6x32xf32>
    %3 = vector.extract_strided_slice %2 {offsets = [0, 0], sizes = [1, 32], strides = [1, 1]} : vector<6x32xf32> to vector<1x32xf32>
    %4 = vector.extract_strided_slice %2 {offsets = [1, 0], sizes = [1, 32], strides = [1, 1]} : vector<6x32xf32> to vector<1x32xf32>
    %5 = vector.extract_strided_slice %2 {offsets = [2, 0], sizes = [1, 32], strides = [1, 1]} : vector<6x32xf32> to vector<1x32xf32>
    %6 = vector.extract_strided_slice %2 {offsets = [3, 0], sizes = [1, 32], strides = [1, 1]} : vector<6x32xf32> to vector<1x32xf32>
    %7 = vector.extract_strided_slice %2 {offsets = [4, 0], sizes = [1, 32], strides = [1, 1]} : vector<6x32xf32> to vector<1x32xf32>
    %8 = vector.extract_strided_slice %2 {offsets = [5, 0], sizes = [1, 32], strides = [1, 1]} : vector<6x32xf32> to vector<1x32xf32>
    %c0_3 = arith.constant 0 : index
    %c0_4 = arith.constant 0 : index
    %9 = vector.load %arg2[%c0_3, %c0_4] : memref<32x32xbf16, #tpu.memory_space<vmem>>, vector<32x32xbf16>
    %cst = arith.constant dense<0.000000e+00> : vector<16x32xf32>
    %10 = tpu.matmul %0, %9, %cst {dimension_numbers = #tpu.dot_dimension_numbers<[1], [0], [0], [1], [0, 0, 1, 1], [], []>} : vector<16x32xbf16>, vector<32x32xbf16>, vector<16x32xf32> -> vector<16x32xf32>
    %11 = vector.broadcast %3 : vector<1x32xf32> to vector<16x32xf32>
    %12 = arith.addf %10, %11 : vector<16x32xf32>
    %13 = arith.addf %1, %12 : vector<16x32xf32>
    %cst_5 = arith.constant dense<0.000000e+00> : vector<16xf32>
    %14 = vector.multi_reduction <add>, %13, %cst_5 [1] : vector<16x32xf32> to vector<16xf32>
    %15 = vector.shape_cast %14 : vector<16xf32> to vector<16x1xf32>
    %cst_6 = arith.constant 3.200000e+01 : f32
    %16 = vector.broadcast %cst_6 : f32 to vector<16x1xf32>
    %17 = arith.divf %15, %16 : vector<16x1xf32>
    %18 = vector.broadcast %17 : vector<16x1xf32> to vector<16x32xf32>
    %19 = arith.subf %13, %18 : vector<16x32xf32>
    %20 = arith.mulf %19, %19 : vector<16x32xf32>
    %cst_7 = arith.constant dense<0.000000e+00> : vector<16xf32>
    %21 = vector.multi_reduction <add>, %20, %cst_7 [1] : vector<16x32xf32> to vector<16xf32>
    %22 = vector.shape_cast %21 : vector<16xf32> to vector<16x1xf32>
    %cst_8 = arith.constant 3.200000e+01 : f32
    %23 = vector.broadcast %cst_8 : f32 to vector<16x1xf32>
    %24 = arith.divf %22, %23 : vector<16x1xf32>
    %cst_9 = arith.constant 9.99999974E-6 : f32
    %25 = vector.broadcast %cst_9 : f32 to vector<16x1xf32>
    %26 = arith.addf %24, %25 : vector<16x1xf32>
    %27 = math.rsqrt %26 : vector<16x1xf32>
    %28 = vector.broadcast %27 : vector<16x1xf32> to vector<16x32xf32>
    %29 = arith.mulf %19, %28 : vector<16x32xf32>
    %30 = vector.broadcast %4 : vector<1x32xf32> to vector<16x32xf32>
    %31 = arith.mulf %29, %30 : vector<16x32xf32>
    %32 = vector.broadcast %5 : vector<1x32xf32> to vector<16x32xf32>
    %33 = arith.addf %31, %32 : vector<16x32xf32>
    %34 = arith.truncf %33 : vector<16x32xf32> to vector<16x32xbf16>
    %c0_10 = arith.constant 0 : index
    %c0_11 = arith.constant 0 : index
    %35 = vector.load %arg3[%c0_10, %c0_11] : memref<32x128xbf16, #tpu.memory_space<vmem>>, vector<32x128xbf16>
    %cst_12 = arith.constant dense<0.000000e+00> : vector<16x128xf32>
    %36 = tpu.matmul %34, %35, %cst_12 {dimension_numbers = #tpu.dot_dimension_numbers<[1], [0], [0], [1], [0, 0, 1, 1], [], []>} : vector<16x32xbf16>, vector<32x128xbf16>, vector<16x128xf32> -> vector<16x128xf32>
    %c0_13 = arith.constant 0 : index
    %c0_14 = arith.constant 0 : index
    %37 = vector.load %arg7[%c0_13, %c0_14] : memref<1x128xf32, #tpu.memory_space<vmem>>, vector<1x128xf32>
    %38 = vector.broadcast %37 : vector<1x128xf32> to vector<16x128xf32>
    %39 = arith.addf %36, %38 : vector<16x128xf32>
    %cst_15 = arith.constant 0.000000e+00 : f32
    %40 = vector.broadcast %cst_15 : f32 to vector<16x128xf32>
    %41 = arith.maximumf %39, %40 : vector<16x128xf32>
    %42 = arith.truncf %41 : vector<16x128xf32> to vector<16x128xbf16>
    %c0_16 = arith.constant 0 : index
    %c0_17 = arith.constant 0 : index
    %43 = vector.load %arg4[%c0_16, %c0_17] : memref<128x32xbf16, #tpu.memory_space<vmem>>, vector<128x32xbf16>
    %cst_18 = arith.constant dense<0.000000e+00> : vector<16x32xf32>
    %44 = tpu.matmul %42, %43, %cst_18 {dimension_numbers = #tpu.dot_dimension_numbers<[1], [0], [0], [1], [0, 0, 1, 1], [], []>} : vector<16x128xbf16>, vector<128x32xbf16>, vector<16x32xf32> -> vector<16x32xf32>
    %45 = vector.broadcast %6 : vector<1x32xf32> to vector<16x32xf32>
    %46 = arith.addf %44, %45 : vector<16x32xf32>
    %47 = arith.addf %33, %46 : vector<16x32xf32>
    %cst_19 = arith.constant dense<0.000000e+00> : vector<16xf32>
    %48 = vector.multi_reduction <add>, %47, %cst_19 [1] : vector<16x32xf32> to vector<16xf32>
    %49 = vector.shape_cast %48 : vector<16xf32> to vector<16x1xf32>
    %cst_20 = arith.constant 3.200000e+01 : f32
    %50 = vector.broadcast %cst_20 : f32 to vector<16x1xf32>
    %51 = arith.divf %49, %50 : vector<16x1xf32>
    %52 = vector.broadcast %51 : vector<16x1xf32> to vector<16x32xf32>
    %53 = arith.subf %47, %52 : vector<16x32xf32>
    %54 = arith.mulf %53, %53 : vector<16x32xf32>
    %cst_21 = arith.constant dense<0.000000e+00> : vector<16xf32>
    %55 = vector.multi_reduction <add>, %54, %cst_21 [1] : vector<16x32xf32> to vector<16xf32>
    %56 = vector.shape_cast %55 : vector<16xf32> to vector<16x1xf32>
    %cst_22 = arith.constant 3.200000e+01 : f32
    %57 = vector.broadcast %cst_22 : f32 to vector<16x1xf32>
    %58 = arith.divf %56, %57 : vector<16x1xf32>
    %cst_23 = arith.constant 9.99999974E-6 : f32
    %59 = vector.broadcast %cst_23 : f32 to vector<16x1xf32>
    %60 = arith.addf %58, %59 : vector<16x1xf32>
    %61 = math.rsqrt %60 : vector<16x1xf32>
    %62 = vector.broadcast %61 : vector<16x1xf32> to vector<16x32xf32>
    %63 = arith.mulf %53, %62 : vector<16x32xf32>
    %64 = vector.broadcast %7 : vector<1x32xf32> to vector<16x32xf32>
    %65 = arith.mulf %63, %64 : vector<16x32xf32>
    %66 = vector.broadcast %8 : vector<1x32xf32> to vector<16x32xf32>
    %67 = arith.addf %65, %66 : vector<16x32xf32>
    %68 = arith.truncf %67 : vector<16x32xf32> to vector<16x32xbf16>
    %c0_24 = arith.constant 0 : index
    %c0_25 = arith.constant 0 : index
    %69 = vector.load %arg5[%c0_24, %c0_25] : memref<32x128xbf16, #tpu.memory_space<vmem>>, vector<32x128xbf16>
    %cst_26 = arith.constant dense<0.000000e+00> : vector<16x128xf32>
    %70 = tpu.matmul %68, %69, %cst_26 {dimension_numbers = #tpu.dot_dimension_numbers<[1], [0], [0], [1], [0, 0, 1, 1], [], []>} : vector<16x32xbf16>, vector<32x128xbf16>, vector<16x128xf32> -> vector<16x128xf32>
    %c0_27 = arith.constant 0 : index
    %c0_28 = arith.constant 0 : index
    %71 = vector.load %arg8[%c0_27, %c0_28] : memref<1x128xf32, #tpu.memory_space<vmem>>, vector<1x128xf32>
    %72 = vector.broadcast %71 : vector<1x128xf32> to vector<16x128xf32>
    %73 = arith.addf %70, %72 : vector<16x128xf32>
    %74 = arith.negf %73 : vector<16x128xf32>
    %75 = math.exp %74 : vector<16x128xf32>
    %cst_29 = arith.constant 1.000000e+00 : f32
    %76 = vector.broadcast %cst_29 : f32 to vector<16x128xf32>
    %77 = arith.addf %76, %75 : vector<16x128xf32>
    %78 = arith.divf %76, %77 : vector<16x128xf32>
    %c0_30 = arith.constant 0 : index
    %c0_31 = arith.constant 0 : index
    %79 = vector.load %arg9[%c0_30, %c0_31] : memref<16x128xf32, #tpu.memory_space<vmem>>, vector<16x128xf32>
    tpu.vector_store %arg9[%c0_30, %c0_31], %78 {strides = array<i32>} : memref<16x128xf32, #tpu.memory_space<vmem>>, vector<16x128xf32>,
    return
  }
  func.func @transform_0(%arg0: i32) -> (i32, i32) {
    %c0_i32 = arith.constant 0 : i32
    %c0_i32_0 = arith.constant 0 : i32
    return %arg0, %c0_i32 : i32, i32
  }
  func.func @transform_1(%arg0: i32) -> (i32, i32) {
    %c0_i32 = arith.constant 0 : i32
    %c0_i32_0 = arith.constant 0 : i32
    %c0_i32_1 = arith.constant 0 : i32
    return %c0_i32, %c0_i32_0 : i32, i32
  }
  func.func @transform_2(%arg0: i32) -> (i32, i32) {
    %c0_i32 = arith.constant 0 : i32
    %c0_i32_0 = arith.constant 0 : i32
    %c0_i32_1 = arith.constant 0 : i32
    return %c0_i32, %c0_i32_0 : i32, i32
  }
  func.func @transform_3(%arg0: i32) -> (i32, i32) {
    %c0_i32 = arith.constant 0 : i32
    %c0_i32_0 = arith.constant 0 : i32
    %c0_i32_1 = arith.constant 0 : i32
    return %c0_i32, %c0_i32_0 : i32, i32
  }
  func.func @transform_4(%arg0: i32) -> (i32, i32) {
    %c0_i32 = arith.constant 0 : i32
    %c0_i32_0 = arith.constant 0 : i32
    %c0_i32_1 = arith.constant 0 : i32
    return %c0_i32, %c0_i32_0 : i32, i32
  }
  func.func @transform_5(%arg0: i32) -> (i32, i32) {
    %c0_i32 = arith.constant 0 : i32
    %c0_i32_0 = arith.constant 0 : i32
    %c0_i32_1 = arith.constant 0 : i32
    return %c0_i32, %c0_i32_0 : i32, i32
  }
  func.func @transform_6(%arg0: i32) -> (i32, i32) {
    %c0_i32 = arith.constant 0 : i32
    %c0_i32_0 = arith.constant 0 : i32
    %c0_i32_1 = arith.constant 0 : i32
    return %c0_i32, %c0_i32_0 : i32, i32
  }
  func.func @transform_7(%arg0: i32) -> (i32, i32) {
    %c0_i32 = arith.constant 0 : i32
    %c0_i32_0 = arith.constant 0 : i32
    %c0_i32_1 = arith.constant 0 : i32
    return %c0_i32, %c0_i32_0 : i32, i32
  }
  func.func @transform_8(%arg0: i32) -> (i32, i32) {
    %c0_i32 = arith.constant 0 : i32
    %c0_i32_0 = arith.constant 0 : i32
    return %arg0, %c0_i32 : i32, i32
  }
}

</mosaic_0001>

<bundles_post_ra>
// kernel: trans_model_forward.1
= control target key start
LH: loop header
LB: loop body
LE: loop exit
PB: predicated region body
PF: predicated region fallthrough
CT: control target
= control target key end

     0   :  { %v610_v1 = vmov 0.0   ;;  %vm611_vm0 = vmmov 0   ;;  %vm61_vm1 = vcmask 261120   ;;  %s775_s0 = inlined_call_operand.vmem [shape: bf16[16,32], index: 0, kind: input, shape index: {}]   ;;  %s776_s1 = inlined_call_operand.vmem [shape: bf16[32,32], index: 1, kind: input, shape index: {}]   ;;  %s777_s2 = inlined_call_operand.vmem [shape: bf16[32,128], index: 2, kind: input, shape index: {}]   ;;  %s778_s3 = inlined_call_operand.vmem [shape: bf16[128,32], index: 3, kind: input, shape index: {}]   ;;  %s779_s4 = inlined_call_operand.vmem [shape: bf16[32,128], index: 4, kind: input, shape index: {}]   ;;  %s780_s5 = inlined_call_operand.vmem [shape: f32[6,32], index: 5, kind: input, shape index: {}]   ;;  %s781_s6 = inlined_call_operand.vmem [shape: f32[1,128], index: 6, kind: input, shape index: {}]   ;;  %s782_s7 = inlined_call_operand.vmem [shape: f32[1,128], index: 7, kind: input, shape index: {}]   ;;  %s783_s8 = inlined_call_operand.hbm [shape: f32[16,128], index: 8, kind: output, shape index: {}]  }
   0x1   :  { %v554_v0 = vld [vmem:[%s776_s1] sm:$0xff]   ;;  %505 = vmatprep.subr.bf16.mxu1 %v610_v1  ;;  %521 = vmatprep.subr.bf16.mxu0 %v610_v1  ;;  %v555_v2 = vld [vmem:[%s776_s1 + $0x8] sm:$0xff]  }
   0x2   :  { %506 = vmatpush3.bf16.msra.mxu1 %v554_v0  ;;  %509 = vmatprep.mubr.msk.bf16.mxu1 %vm611_vm0, %v610_v1  ;;  %v31_v3 = vld [vmem:[%s775_s0] sm:$0xff]  }
   0x3   :  { %507 = vmatprep.subr.bf16.mxu1 %v610_v1  ;;  %537 = vmatprep.mubr.msk.bf16.mxu0 %vm611_vm0, %v610_v1 }
   0x6   :  { %508 = vmatpush3.bf16.msra.mxu1 %v555_v2 }
   0x7   :  { %513 = vmatprep.subr.bf16.mxu1 %v610_v1 }
   0x9   :  { %510 = vmatmul.mubr.msk.bf16.vlgmr.msra.gmra.mrb[0].mxu1 %vm61_vm1, %v31_v3 }
   0xa   :  { %517 = vmatprep.mubr.msk.bf16.mxu1 %vm611_vm0, %v610_v1 }
   0xb   :  { %13 = vsyncpa [#allocation3], 0  ;;  %v40_v4 = vlaneseq  ;;  %v686_v7 = vld [vmem:[%s780_s5] sm:$0x3f]  ;;  %v33_v9 = vunpack.c.l.bf16 %v31_v3  ;;  %v34_v13 = vunpack.c.h.bf16 %v31_v3  ;;  %v558_v32 = vld [vmem:[%s777_s2 + $0x8] sm:$0xff]   ;;  %s612_s1 = smov [#allocation2]  }
   0xc   :  { %v557_v31 = vld [vmem:[%s777_s2] sm:$0xff]   ;;  %v560_v34 = vld [vmem:[%s778_s3 + $0x8] sm:$0xff]   ;;  %v561_v35 = vld [vmem:[%s778_s3 + $0x10] sm:$0xff]   ;;  %s454_s5 = sshll.u32 %s612_s1, 4  ;;  %s455_s5 = int_to_ptr.vmem [resolvable:$true] %s454_s5 }
   0xd   :  { %v680_v5 = vshrl.u32 %v40_v4, 7  ;;  %514 = vmatpush3.bf16.msra.mxu1 %v557_v31  ;;  %v559_v33 = vld [vmem:[%s778_s3] sm:$0xff]   ;;  %v562_v36 = vld [vmem:[%s778_s3 + $0x18] sm:$0xff]   ;;  %v564_v38 = vld [vmem:[%s778_s3 + $0x28] sm:$0xff]   ;;  %p591_p1 = scmp.lt.s32.totalorder %s455_s5, %s455_s5 }
   0xe   :  { %515 = vmatprep.subr.bf16.mxu1 %v610_v1  ;;  %522 = vmatpush3.bf16.msra.mxu0 %v559_v33  ;;  %v563_v37 = vld [vmem:[%s778_s3 + $0x20] sm:$0xff]   ;;  %v565_v58 = vld [vmem:[%s778_s3 + $0x30] sm:$0xff]   ;;  %v566_v59 = vld [vmem:[%s778_s3 + $0x38] sm:$0xff]  }
   0xf   :  { %v42_v6 = vsub.s32 0, %v680_v5  ;;  %523 = vmatprep.subr.bf16.mxu0 %v610_v1  ;;  %v137_v45 = vsub.s32 1, %v680_v5  ;;  %v143_v49 = vsub.s32 2, %v680_v5  ;;  %v469_v60 = vld [vmem:[%s781_s6] ss:$0 sm:$0xff] }
  0x10   :  { %v567_v31 = vld [vmem:[%s779_s4] sm:$0xff]  }
  0x11   :  { %v43_v8 = vrot.slane %v686_v7, %v42_v6  ;;  %516 = vmatpush3.bf16.msra.mxu1 %v558_v32  ;;  %v138_v47 = vrot.slane %v686_v7, %v137_v45  ;;  %v144_v53 = vrot.slane %v686_v7, %v143_v49  ;;  %v568_v32 = vld [vmem:[%s779_s4 + $0x8] sm:$0xff]  }
  0x12   :  { %541 = vmatprep.subr.bf16.mxu1 %v610_v1  ;;  %524 = vmatpush3.bf16.msra.mxu0 %v560_v34 }
  0x13   :  { %525 = vmatprep.subr.bf16.mxu0 %v610_v1 }
  0x16   :  { %526 = vmatpush3.bf16.msra.mxu0 %v561_v35 }
  0x17   :  { %527 = vmatprep.subr.bf16.mxu0 %v610_v1 }
  0x1a   :  { %528 = vmatpush3.bf16.msra.mxu0 %v562_v36 }
  0x1b   :  { %529 = vmatprep.subr.bf16.mxu0 %v610_v1 }
  0x1e   :  { %530 = vmatpush3.bf16.msra.mxu0 %v563_v37 }
  0x1f   :  { %531 = vmatprep.subr.bf16.mxu0 %v610_v1 }
  0x22   :  { %532 = vmatpush3.bf16.msra.mxu0 %v564_v38 }
  0x23   :  { %533 = vmatprep.subr.bf16.mxu0 %v610_v1 }
  0x26   :  { %534 = vmatpush3.bf16.msra.mxu0 %v565_v58 }
  0x27   :  { %535 = vmatprep.subr.bf16.mxu0 %v610_v1 }
  0x2a   :  { %536 = vmatpush3.bf16.msra.mxu0 %v566_v59 }
  0xdc   :  { %v99_v10 = vpop.f32.mrb[0].mxu1 }
  0xdd   :  { %v100_v11 = vadd.f32 %v99_v10, %v43_v8  ;;  %v511_v12 = vpop.f32.mrb[1].mxu1 }
  0xde   :  { %v102_v14 = vpop.f32.mrb[2].mxu1 }
  0xdf   :  { %v103_v15 = vadd.f32 %v102_v14, %v43_v8  ;;  %v512_v16 = vpop.f32.mrb[3].mxu1  ;;  %v106_v17 = vadd.f32 %v100_v11, %v33_v9  ;;  %v236_v9 = vsub.s32 3, %v680_v5 }
  0xe1   :  { %v108_v18 = vsel %vm61_vm1, %v106_v17, 0.0  ;;  %v107_v19 = vadd.f32 %v103_v15, %v34_v13  ;;  %v237_v10 = vrot.slane %v686_v7, %v236_v9 }
  0xe2   :  { %109 = vadd.xlane.f32.xlu0 %v108_v18 }
  0xe3   :  { %v111_v20 = vsel %vm61_vm1, %v107_v19, 0.0 }
  0xe6   :  { %112 = vadd.xlane.f32.xlu0 %v111_v20 }
 0x16f   :  { %v110_v21 = vpop.xlane.xlu0 %109 }
 0x170   :  { %v115_v22 = vmul.f32 0.03125, %v110_v21 }
 0x172   :  { %v117_v23 = vsub.f32 %v106_v17, %v115_v22 }
 0x173   :  { %v113_v24 = vpop.xlane.xlu0 %112 }
 0x174   :  { %v116_v25 = vmul.f32 0.03125, %v113_v24  ;;  %v119_v26 = vmul.f32 %v117_v23, %v117_v23 }
 0x176   :  { %v118_v27 = vsub.f32 %v107_v19, %v116_v25  ;;  %v121_v28 = vsel %vm61_vm1, %v119_v26, 0.0 }
 0x177   :  { %122 = vadd.xlane.f32.xlu1 %v121_v28 }
 0x178   :  { %v120_v29 = vmul.f32 %v118_v27, %v118_v27 }
 0x17a   :  { %v124_v30 = vsel %vm61_vm1, %v120_v29, 0.0 }
 0x17b   :  { %125 = vadd.xlane.f32.xlu1 %v124_v30 }
 0x204   :  { %v123_v39 = vpop.xlane.xlu1 %122 }
 0x205   :  { %v127_v40 = vmul.f32 0.03125, %v123_v39  ;;  %v357_v39 = vsub.s32 4, %v680_v5 }
 0x207   :  { %v129_v41 = vadd.f32 1e-05, %v127_v40  ;;  %v358_v40 = vrot.slane %v686_v7, %v357_v39 }
 0x208   :  { %v126_v42 = vpop.xlane.xlu1 %125 }
 0x209   :  { %570 = vrsqrt.f32 %v129_v41  ;;  %v128_v43 = vmul.f32 0.03125, %v126_v42  ;;  %v363_v41 = vsub.s32 5, %v680_v5 }
 0x20b   :  { %v130_v44 = vadd.f32 1e-05, %v128_v43 }
 0x20d   :  { %572 = vrsqrt.f32 %v130_v44 }
 0x213   :  { %v571_v46 = vpop.eup %570 }
 0x214   :  { %v133_v48 = vmul.f32 %v571_v46, %v117_v23  ;;  %v364_v46 = vrot.slane %v686_v7, %v363_v41 }
 0x216   :  { %v139_v51 = vmul.f32 %v138_v47, %v133_v48 }
 0x217   :  { %v573_v50 = vpop.eup %572 }
 0x218   :  { %v134_v52 = vmul.f32 %v573_v50, %v118_v27  ;;  %v145_v55 = vadd.f32 %v144_v53, %v139_v51  ;;  %v481_v51 = vld [vmem:[%s782_s7] ss:$0 sm:$0xff]  ;;  %s586_s7 = scalar_lea.vmem %s455_s5, 256 }
 0x219   :  { %p587_p0 = scmp.ne.s32.totalorder %s455_s5, %s586_s7  ;;  %p592_p2 = scmp.lt.s32.totalorder %s586_s7, %s586_s7 }
 0x21a   :  { %v140_v54 = vmul.f32 %v138_v47, %v134_v52 }
 0x21b   :  { %p593_p3 = por %p592_p2, %p591_p1 }
 0x21c   :  { %v146_v56 = vadd.f32 %v144_v53, %v140_v54 }
 0x21d   :  { %p594_p4 = pnand %p593_p3, %p587_p0 }
 0x21e   :  { %v147_v57 = vpack.c.bf16 %v146_v56, %v145_v55 }
 0x220   :  { %518 = vmatmul.mubr.msk.bf16.vlgmr.msra.gmra.mrb[4].mxu1 %vm61_vm1, %v147_v57 }
 0x221   :  { %545 = vmatprep.mubr.msk.bf16.mxu1 %vm611_vm0, %v610_v1  ;;  %542 = vmatpush3.bf16.msra.mxu1 %v567_v31 }
 0x222   :  { %543 = vmatprep.subr.bf16.mxu1 %v610_v1 }
 0x225   :  { %544 = vmatpush3.bf16.msra.mxu1 %v568_v32 }
 0x2f3   :  { %v208_v61 = vpop.f32.mrb[4].mxu1 }
 0x2f4   :  { %v209_v62 = vadd.f32 %v469_v60, %v208_v61  ;;  %v519_v63 = vpop.f32.mrb[5].mxu1 }
 0x2f5   :  { %v211_v0 = vpop.f32.mrb[6].mxu1 }
 0x2f6   :  { %v212_v2 = vadd.f32 %v469_v60, %v211_v0  ;;  %v520_v3 = vpop.f32.mrb[7].mxu1  ;;  %v215_v4 = vmax.f32 %v209_v62, 0.0 }
 0x2f8   :  { %v216_v6 = vmax.f32 %v212_v2, 0.0 }
 0x2fa   :  { %v217_v8 = vpack.c.bf16 %v216_v6, %v215_v4 }
 0x2fc   :  { %538 = vmatmul.mubr.bf16.vlgmr.msra.gmra.mrb[0].mxu0 %v217_v8 }
 0x3cf   :  { %v320_v11 = vpop.f32.mrb[0].mxu0 }
 0x3d0   :  { %v321_v12 = vadd.f32 %v320_v11, %v237_v10  ;;  %v539_v13 = vpop.f32.mrb[1].mxu0 }
 0x3d1   :  { %v323_v14 = vpop.f32.mrb[2].mxu0 }
 0x3d2   :  { %v324_v15 = vadd.f32 %v323_v14, %v237_v10  ;;  %v540_v16 = vpop.f32.mrb[3].mxu0  ;;  %v327_v17 = vadd.f32 %v321_v12, %v145_v55 }
 0x3d4   :  { %v329_v18 = vsel %vm61_vm1, %v327_v17, 0.0  ;;  %v328_v19 = vadd.f32 %v324_v15, %v146_v56 }
 0x3d5   :  { %330 = vadd.xlane.f32.xlu0 %v329_v18 }
 0x3d6   :  { %v332_v20 = vsel %vm61_vm1, %v328_v19, 0.0 }
 0x3d7   :  { %333 = vadd.xlane.f32.xlu1 %v332_v20 }
 0x462   :  { %v331_v21 = vpop.xlane.xlu0 %330 }
 0x463   :  { %v335_v22 = vmul.f32 0.03125, %v331_v21 }
 0x464   :  { %v334_v23 = vpop.xlane.xlu1 %333 }
 0x465   :  { %v337_v24 = vsub.f32 %v327_v17, %v335_v22  ;;  %v336_v25 = vmul.f32 0.03125, %v334_v23 }
 0x467   :  { %v338_v26 = vsub.f32 %v328_v19, %v336_v25  ;;  %v339_v27 = vmul.f32 %v337_v24, %v337_v24 }
 0x469   :  { %v341_v28 = vsel %vm61_vm1, %v339_v27, 0.0  ;;  %v340_v29 = vmul.f32 %v338_v26, %v338_v26 }
 0x46a   :  { %342 = vadd.xlane.f32.xlu0 %v341_v28 }
 0x46b   :  { %v344_v30 = vsel %vm61_vm1, %v340_v29, 0.0 }
 0x46c   :  { %345 = vadd.xlane.f32.xlu1 %v344_v30 }
 0x4f7   :  { %v343_v33 = vpop.xlane.xlu0 %342 }
 0x4f8   :  { %v347_v34 = vmul.f32 0.03125, %v343_v33 }
 0x4f9   :  { %v346_v35 = vpop.xlane.xlu1 %345 }
 0x4fa   :  { %v349_v36 = vadd.f32 1e-05, %v347_v34  ;;  %v348_v37 = vmul.f32 0.03125, %v346_v35 }
 0x4fc   :  { %574 = vrsqrt.f32 %v349_v36  ;;  %v350_v38 = vadd.f32 1e-05, %v348_v37 }
 0x4fe   :  { %576 = vrsqrt.f32 %v350_v38 }
 0x506   :  { %v575_v1 = vpop.eup %574 }
 0x507   :  { %v353_v42 = vmul.f32 %v575_v1, %v337_v24 }
 0x508   :  { %v577_v43 = vpop.eup %576 }
 0x509   :  { %v359_v44 = vmul.f32 %v358_v40, %v353_v42  ;;  %v354_v45 = vmul.f32 %v577_v43, %v338_v26 }
 0x50b   :  { %v360_v47 = vmul.f32 %v358_v40, %v354_v45  ;;  %v365_v48 = vadd.f32 %v364_v46, %v359_v44 }
 0x50d   :  { %v366_v49 = vadd.f32 %v364_v46, %v360_v47 }
 0x50f   :  { %v367_v50 = vpack.c.bf16 %v366_v49, %v365_v48 }
 0x511   :  { %546 = vmatmul.mubr.msk.bf16.vlgmr.msra.gmra.mrb[8].mxu1 %vm61_vm1, %v367_v50 }
 0x5e4   :  { %v428_v52 = vpop.f32.mrb[8].mxu1 }
 0x5e5   :  { %v429_v53 = vadd.f32 %v481_v51, %v428_v52  ;;  %v547_v5 = vpop.f32.mrb[9].mxu1 }
 0x5e6   :  { %v431_v54 = vpop.f32.mrb[10].mxu1 }
 0x5e7   :  { %v485_v55 = vmul.f32 -1.442695, %v429_v53  ;;  %v432_v56 = vadd.f32 %v481_v51, %v431_v54  ;;  %v548_v57 = vpop.f32.mrb[11].mxu1 }
 0x5e9   :  { %578 = vpow2.f32 %v485_v55  ;;  %v486_v58 = vmul.f32 -1.442695, %v432_v56 }
 0x5eb   :  { %580 = vpow2.f32 %v486_v58 }
 0x5f3   :  { %v579_v7 = vpop.eup %578 }
 0x5f4   :  { %v441_v59 = vadd.f32 1.0, %v579_v7 }
 0x5f5   :  { %v581_v60 = vpop.eup %580 }
 0x5f6   :  { %582 = vrcp.f32 %v441_v59  ;;  %v442_v61 = vadd.f32 1.0, %v581_v60 }
 0x5f8   :  { %584 = vrcp.f32 %v442_v61 }
 0x600   :  { %v583_v62 = vpop.eup %582 }
 0x601   :  { %447 = vst [vmem:[#allocation2] sm:$0xff] %v583_v62 }
 0x602   :  { %v585_v63 = vpop.eup %584 }
 0x603   :  { %448 = vst [vmem:[#allocation2 + $0x8] sm:$0xff] %v585_v63 }
 0x604   :  { %597 = shalt.err (!%p594_p4)
}
 0x605   :  { %s598_s13 = scalar_lea.hbm %s783_s8, 256 }
 0x606   :  { %p599_p5 = scmp.ne.s32.totalorder %s783_s8, %s598_s13  ;;  %p602_p6 = scmp.lt.u32.totalorder %s598_s13, %s783_s8 }
 0x608   :  { %p604_p7 = pnand %p602_p6, %p599_p5 }
 0x60a   :  { %607 = shalt.err (!%p604_p7)
}
 0x60b   :  { %s613_s18 = smov 128   ;;  %s614_s19 = smov 8  }
 0x60c   :  { %460 = dma.vmem_to_hbm [thread:$0]  %s455_s5, 256, %s783_s8, [#allocation3], %s613_s18, %s613_s18, %s614_s19  }
 0x60d   :  { %608 = dma.done.wait [#allocation3], 256  }
 0x60e   :  { %609 = vsyncadd [#allocation3], 4294967040 }
 0x60f   :  { %464 = vsyncpa [#allocation3], 1 }

</bundles_post_ra>
